<compile_context>
chip_gen: v6e
topology: v6e:2x2x1
jax: 0.10.0
libtpu: 0.0.40
codegen_flags: <defaults>
</compile_context>

<pallas_src>
import jax
import jax.numpy as jnp
from jax import lax
from jax.experimental import pallas as pl
from jax.experimental.pallas import tpu as pltpu


def _edge_decoder_kernel(row_ref, col_ref, upT_ref, mpT_ref, w2_ref, b2_ref,
                         out_ref):
    te = row_ref.shape[1]
    n_user = upT_ref.shape[1]
    n_movie = mpT_ref.shape[1]

    rid = row_ref[...]                                     # (1, TE) int32
    cid = col_ref[...]                                     # (1, TE) int32

    # Transposed one-hot gathers: column e of (upT @ oh_u) is u_proj[row[e]].
    oh_u = (lax.broadcasted_iota(jnp.int32, (n_user, te), 0)
            == rid).astype(upT_ref.dtype)                  # (n_user, TE)
    oh_m = (lax.broadcasted_iota(jnp.int32, (n_movie, te), 0)
            == cid).astype(mpT_ref.dtype)                  # (n_movie, TE)

    h = jnp.dot(upT_ref[...], oh_u,
                preferred_element_type=jnp.float32)        # (H, TE)
    h = h + jnp.dot(mpT_ref[...], oh_m,
                    preferred_element_type=jnp.float32)    # += movie half
    h = jnp.maximum(h, 0.0)                                # relu (b1 folded in)

    out = jnp.dot(w2_ref[...], h,
                  preferred_element_type=jnp.float32)      # (1, TE) lane-dense
    out_ref[...] = (out + b2_ref[0, 0]).astype(out_ref.dtype)


def edge_decoder_forward(z_user, z_movie, edge_label_index, params, *,
                         tile_edges=2048, compute_dtype=jnp.float32):
    """params = dict(w1=(H,2H), b1=(H,), w2=(1,H), b2=(1,)) -- PyTorch Linear layout."""
    assert tile_edges % 128 == 0, "tile_edges must be a multiple of 128"
    row, col = edge_label_index
    e = row.shape[0]
    n_user, hdim = z_user.shape
    n_movie, _ = z_movie.shape

    # One-time pre-projection of the node tables (moves the K=2H matmul out of
    # the per-edge kernel); b1 is folded into the user half.
    w1 = params["w1"].astype(jnp.float32)                  # (H, 2H)
    u_proj = (z_user.astype(jnp.float32) @ w1[:, :hdim].T
              + params["b1"].astype(jnp.float32))          # (n_user, H)
    m_proj = z_movie.astype(jnp.float32) @ w1[:, hdim:].T  # (n_movie, H)
    upT = u_proj.T.astype(compute_dtype)                   # (H, n_user)  resident
    mpT = m_proj.T.astype(compute_dtype)                   # (H, n_movie) resident

    w2 = params["w2"].reshape(1, hdim).astype(jnp.float32)
    b2 = params["b2"].reshape(1, 1).astype(jnp.float32)    # SMEM scalar

    # Edge-tile size: as large as requested but capped from E (rounded to 128)
    # and split so there are >=2 tiles when possible (v7x has 2 TensorCores).
    tile = max(128, min(tile_edges, pl.cdiv(pl.cdiv(e, 2), 128) * 128))
    n_tiles = pl.cdiv(e, tile)
    e_pad = n_tiles * tile
    pad = e_pad - e

    # Lane-dense (1, E_pad) index streams (padded edges reuse index 0; their
    # scores are sliced away below).
    row_p = jnp.pad(row.astype(jnp.int32), (0, pad)).reshape(1, e_pad)
    col_p = jnp.pad(col.astype(jnp.int32), (0, pad)).reshape(1, e_pad)

    out = pl.pallas_call(
        _edge_decoder_kernel,
        out_shape=jax.ShapeDtypeStruct((1, e_pad), jnp.float32),
        grid=(n_tiles,),
        in_specs=[
            pl.BlockSpec((1, tile), lambda i: (0, i)),          # row ids (lane-dense)
            pl.BlockSpec((1, tile), lambda i: (0, i)),          # col ids (lane-dense)
            pl.BlockSpec((hdim, n_user), lambda i: (0, 0)),     # u_proj^T (resident)
            pl.BlockSpec((hdim, n_movie), lambda i: (0, 0)),    # m_proj^T (resident)
            pl.BlockSpec((1, hdim), lambda i: (0, 0)),          # w2 row   (resident)
            pl.BlockSpec(memory_space=pltpu.MemorySpace.SMEM),  # b2 scalar
        ],
        out_specs=pl.BlockSpec((1, tile), lambda i: (0, i)),    # lane-dense (1, TE)
        compiler_params=pltpu.CompilerParams(
            dimension_semantics=("parallel",)),
    )(row_p, col_p, upT, mpT, w2, b2)
    return out.reshape(-1)[:e]                                  # == z.view(-1)


def _reference_forward(z_user, z_movie, edge_label_index, params):
    row, col = edge_label_index
    z = jnp.concatenate([z_user[row], z_movie[col]], axis=-1)
    z = jnp.maximum(z @ params["w1"].T + params["b1"], 0.0)
    z = z @ params["w2"].T + params["b2"]
    return z.reshape(-1)


if __name__ == "__main__":
    H = 32                 # hidden_channels
    N_USER, N_MOVIE = 32, 64
    E = 1000               # deliberately NOT a multiple of the edge tile

    key = jax.random.PRNGKey(0)
    k_zu, k_zm, k_row, k_col, k_w1, k_b1, k_w2, k_b2 = jax.random.split(key, 8)

    z_user = jax.random.normal(k_zu, (N_USER, H), dtype=jnp.float32)
    z_movie = jax.random.normal(k_zm, (N_MOVIE, H), dtype=jnp.float32)
    row = jax.random.randint(k_row, (E,), 0, N_USER, dtype=jnp.int32)
    col = jax.random.randint(k_col, (E,), 0, N_MOVIE, dtype=jnp.int32)

    # Deterministic synthetic parameters (PyTorch nn.Linear weight layout).
    params = {
        "w1": jax.random.normal(k_w1, (H, 2 * H), dtype=jnp.float32) * 0.1,
        "b1": jax.random.normal(k_b1, (H,), dtype=jnp.float32) * 0.1,
        "w2": jax.random.normal(k_w2, (1, H), dtype=jnp.float32) * 0.1,
        "b2": jax.random.normal(k_b2, (1,), dtype=jnp.float32) * 0.1,
    }

    out = edge_decoder_forward(z_user, z_movie, (row, col), params)
    out = jax.block_until_ready(out)

    ref = _reference_forward(z_user, z_movie, (row, col), params)
    assert out.shape == (E,)
    assert jnp.allclose(out, ref, atol=1e-4, rtol=1e-4), \
        float(jnp.max(jnp.abs(out - ref)))
    print("KERNEL_OK")
</pallas_src>

<mosaic_0001>
module attributes {stable_mosaic.version = 11 : i64} {
  func.func @_edge_decoder_kernel(%arg0: i32, %arg1: memref<1x512xi32, #tpu.memory_space<vmem>>, %arg2: memref<1x512xi32, #tpu.memory_space<vmem>>, %arg3: memref<32x32xf32, #tpu.memory_space<vmem>>, %arg4: memref<32x64xf32, #tpu.memory_space<vmem>>, %arg5: memref<1x32xf32, #tpu.memory_space<vmem>>, %arg6: memref<1x1xf32, #tpu.memory_space<smem>>, %arg7: memref<1x512xf32, #tpu.memory_space<vmem>>) attributes {dimension_semantics = [#tpu.dimension_semantics<parallel>], iteration_bounds = array<i64: 2>, scalar_prefetch = 0 : i64, scratch_operands = 0 : i64, tpu.core_type = #tpu.core_type<tc>, window_params = [{transform_indices = @transform_0, window_bounds = array<i64: 1, 512>}, {transform_indices = @transform_1, window_bounds = array<i64: 1, 512>}, {pipeline_mode = #tpu.pipeline_mode<synchronous>, transform_indices = @transform_2, window_bounds = array<i64: 32, 32>}, {pipeline_mode = #tpu.pipeline_mode<synchronous>, transform_indices = @transform_3, window_bounds = array<i64: 32, 64>}, {pipeline_mode = #tpu.pipeline_mode<synchronous>, transform_indices = @transform_4, window_bounds = array<i64: 1, 32>}, {transform_indices = @transform_5, window_bounds = array<i64: 1, 1>}, {transform_indices = @transform_6, window_bounds = array<i64: 1, 512>}]} {
    %c0 = arith.constant 0 : index
    %c0_0 = arith.constant 0 : index
    %0 = vector.load %arg1[%c0, %c0_0] : memref<1x512xi32, #tpu.memory_space<vmem>>, vector<1x512xi32>
    %c0_1 = arith.constant 0 : index
    %c0_2 = arith.constant 0 : index
    %1 = vector.load %arg2[%c0_1, %c0_2] : memref<1x512xi32, #tpu.memory_space<vmem>>, vector<1x512xi32>
    %2 = tpu.iota {dimensions = array<i32: 0>} : vector<32x512xi32>
    %3 = vector.broadcast %0 : vector<1x512xi32> to vector<32x512xi32>
    %4 = arith.cmpi eq, %2, %3 : vector<32x512xi32>
    %5 = arith.extui %4 : vector<32x512xi1> to vector<32x512xi32>
    %6 = arith.sitofp %5 : vector<32x512xi32> to vector<32x512xf32>
    %7 = tpu.iota {dimensions = array<i32: 0>} : vector<64x512xi32>
    %8 = vector.broadcast %1 : vector<1x512xi32> to vector<64x512xi32>
    %9 = arith.cmpi eq, %7, %8 : vector<64x512xi32>
    %10 = arith.extui %9 : vector<64x512xi1> to vector<64x512xi32>
    %11 = arith.sitofp %10 : vector<64x512xi32> to vector<64x512xf32>
    %c0_3 = arith.constant 0 : index
    %c0_4 = arith.constant 0 : index
    %12 = vector.load %arg3[%c0_3, %c0_4] : memref<32x32xf32, #tpu.memory_space<vmem>>, vector<32x32xf32>
    %cst = arith.constant dense<0.000000e+00> : vector<32x512xf32>
    %13 = tpu.matmul %12, %6, %cst {dimension_numbers = #tpu.dot_dimension_numbers<[1], [0], [0], [1], [0, 0, 1, 1], [], []>} : vector<32x32xf32>, vector<32x512xf32>, vector<32x512xf32> -> vector<32x512xf32>
    %c0_5 = arith.constant 0 : index
    %c0_6 = arith.constant 0 : index
    %14 = vector.load %arg4[%c0_5, %c0_6] : memref<32x64xf32, #tpu.memory_space<vmem>>, vector<32x64xf32>
    %cst_7 = arith.constant dense<0.000000e+00> : vector<32x512xf32>
    %15 = tpu.matmul %14, %11, %cst_7 {dimension_numbers = #tpu.dot_dimension_numbers<[1], [0], [0], [1], [0, 0, 1, 1], [], []>} : vector<32x64xf32>, vector<64x512xf32>, vector<32x512xf32> -> vector<32x512xf32>
    %16 = arith.addf %13, %15 : vector<32x512xf32>
    %cst_8 = arith.constant 0.000000e+00 : f32
    %17 = vector.broadcast %cst_8 : f32 to vector<32x512xf32>
    %18 = arith.maximumf %16, %17 : vector<32x512xf32>
    %c0_9 = arith.constant 0 : index
    %c0_10 = arith.constant 0 : index
    %19 = vector.load %arg5[%c0_9, %c0_10] : memref<1x32xf32, #tpu.memory_space<vmem>>, vector<1x32xf32>
    %cst_11 = arith.constant dense<0.000000e+00> : vector<1x512xf32>
    %20 = tpu.matmul %19, %18, %cst_11 {dimension_numbers = #tpu.dot_dimension_numbers<[1], [0], [0], [1], [0, 0, 1, 1], [], []>} : vector<1x32xf32>, vector<32x512xf32>, vector<1x512xf32> -> vector<1x512xf32>
    %c0_12 = arith.constant 0 : index
    %c0_13 = arith.constant 0 : index
    %21 = memref.load %arg6[%c0_12, %c0_13] : memref<1x1xf32, #tpu.memory_space<smem>>
    %22 = vector.broadcast %21 : f32 to vector<1x512xf32>
    %23 = arith.addf %20, %22 : vector<1x512xf32>
    %c0_14 = arith.constant 0 : index
    %c0_15 = arith.constant 0 : index
    %24 = vector.load %arg7[%c0_14, %c0_15] : memref<1x512xf32, #tpu.memory_space<vmem>>, vector<1x512xf32>
    tpu.vector_store %arg7[%c0_14, %c0_15], %23 {strides = array<i32>} : memref<1x512xf32, #tpu.memory_space<vmem>>, vector<1x512xf32>,
    return
  }
  func.func @transform_0(%arg0: i32) -> (i32, i32) {
    %c0_i32 = arith.constant 0 : i32
    %c0_i32_0 = arith.constant 0 : i32
    return %c0_i32, %arg0 : i32, i32
  }
  func.func @transform_1(%arg0: i32) -> (i32, i32) {
    %c0_i32 = arith.constant 0 : i32
    %c0_i32_0 = arith.constant 0 : i32
    return %c0_i32, %arg0 : i32, i32
  }
  func.func @transform_2(%arg0: i32) -> (i32, i32) {
    %c0_i32 = arith.constant 0 : i32
    %c0_i32_0 = arith.constant 0 : i32
    %c0_i32_1 = arith.constant 0 : i32
    return %c0_i32, %c0_i32_0 : i32, i32
  }
  func.func @transform_3(%arg0: i32) -> (i32, i32) {
    %c0_i32 = arith.constant 0 : i32
    %c0_i32_0 = arith.constant 0 : i32
    %c0_i32_1 = arith.constant 0 : i32
    return %c0_i32, %c0_i32_0 : i32, i32
  }
  func.func @transform_4(%arg0: i32) -> (i32, i32) {
    %c0_i32 = arith.constant 0 : i32
    %c0_i32_0 = arith.constant 0 : i32
    %c0_i32_1 = arith.constant 0 : i32
    return %c0_i32, %c0_i32_0 : i32, i32
  }
  func.func @transform_5(%arg0: i32) -> (i32, i32) {
    %c0_i32 = arith.constant 0 : i32
    %c0_i32_0 = arith.constant 0 : i32
    %c0_i32_1 = arith.constant 0 : i32
    return %c0_i32, %c0_i32_0 : i32, i32
  }
  func.func @transform_6(%arg0: i32) -> (i32, i32) {
    %c0_i32 = arith.constant 0 : i32
    %c0_i32_0 = arith.constant 0 : i32
    return %c0_i32, %arg0 : i32, i32
  }
}

</mosaic_0001>

<bundles_post_ra>
// kernel: tpu_custom_call.1
= control target key start
LH: loop header
LB: loop body
LE: loop exit
PB: predicated region body
PF: predicated region fallthrough
CT: control target
= control target key end

     0   :  { %s2129_s0 = inlined_call_operand.hbm [shape: s32[1,1024], index: 0, kind: input, shape index: {}]   ;;  %s2130_s1 = inlined_call_operand.hbm [shape: s32[1,1024], index: 1, kind: input, shape index: {}]   ;;  %s2131_s2 = inlined_call_operand.hbm [shape: f32[32,32], index: 2, kind: input, shape index: {}]   ;;  %s2132_s3 = inlined_call_operand.hbm [shape: f32[32,64], index: 3, kind: input, shape index: {}]   ;;  %s2133_s4 = inlined_call_operand.vmem [shape: f32[1,32], index: 4, kind: input, shape index: {}]   ;;  %s2134_s5 = inlined_call_operand.<no memory space> [shape: f32[1,1], index: 5, kind: input, shape index: {}]   ;;  %s2135_s6 = inlined_call_operand.hbm [shape: f32[1,1024], index: 6, kind: output, shape index: {}]  }
   0x1   :  { %2140 = sst [smem:[#allocation17_spill]] %s2131_s2 }
   0x2   :  { %2141 = sst [smem:[#allocation18_spill]] %s2132_s3 }
   0x3   :  { %11 = sst [smem:[#allocation2]] %s2134_s5 }
   0x4   :  { %12 = vsyncpa [#allocation4], 0 }
   0x5   :  { %14 = vsyncpa [#allocation4 + $0x1], 0 }
   0x6   :  { %15 = vsyncpa [#allocation7], 0 }
   0x7   :  { %17 = vsyncpa [#allocation7 + $0x1], 0 }
   0x8   :  { %18 = vsyncpa [#allocation10], 0 }
   0x9   :  { %19 = vsyncpa [#allocation5], 0 }
   0xa   :  { %21 = vsyncpa [#allocation5 + $0x1], 0  ;;  %s1691_s23 = smov 0   ;;  %s1693_s24 = smov 0  }
   0xb   :  { %s1695_s25 = smov 0   ;;  %s1697_s26 = smov 0  }
   0xc LB: > { %s1712_s5 = sadd.s32 4294967295, %s1641_s26   ;;  %s1241_s27 = sadd.s32 4294967294, %s1641_s26   ;;  %s1641_s26 = sphi %s1697_s26, %s2163_s26   ;;  %s1637_s25 = sphi %s1695_s25, %s2162_s25   ;;  %s1633_s24 = sphi %s1693_s24, %s2161_s24   ;;  %s1629_s23 = sphi %s1691_s23, %s2160_s23  }
   0xd   : > { %p47_p0 = scmp.ne.s32.totalorder %s1633_s24, %s1629_s23  ;;  %p2136_p1 = scmp.eq.s32.totalorder %s1712_s5, 0 }
   0xe   : > { %p187_p3 = scmp.eq.s32.totalorder %s1241_s27, 1  ;;  %p1242_p5 = scmp.ge.s32.totalorder %s1641_s26, 1 }
   0xf   : > { %p1721_p4 = por %p2136_p1, %p47_p0  ;;  %p194_p7 = scmp.lt.s32.totalorder %s1641_s26, 3 }
  0x10   : > { %p1726_p6 = por %p187_p3, %p47_p0  ;;  %s1643_s7 = smov [#allocation8]  }
  0x11   : > { %s2142_s28 = scalar_select %p1721_p4, 1, 0 }
  0x12   : > { %s2143_s29 = scalar_select %p1726_p6, 1, 0 }
  0x13   : > { %p1731_p8 = pnand %p1242_p5, %p194_p7  ;;  %s206_s8 = sshll.u32 %s1643_s7, 4  ;;  %s207_s8 = int_to_ptr.vmem [resolvable:$true] %s206_s8 }
  0x14   : > { %s1644_s10 = smov [#allocation9]   ;;  %s1468_s12 = scalar_lea.vmem %s207_s8, 512 }
  0x15   : > { %s2144_s30 = scalar_select %p1731_p8, 1, 0 }
  0x16   : > { %p1394_p9 = pneg %p1731_p8  ;;  %s219_s11 = sshll.u32 %s1644_s10, 4  ;;  %s220_s11 = int_to_ptr.vmem [resolvable:$true] %s219_s11 }
  0x17   : > { %p1469_p13 = scmp.ne.s32.totalorder %s207_s8, %s1468_s12  ;;  %p1476_p5 = scmp.lt.s32.totalorder %s207_s8, %s207_s8 }
  0x18   : > { %p1740_p11 = pnand %p1394_p9, %p2136_p1  ;;  %p1477_p7 = scmp.lt.s32.totalorder %s1468_s12, %s1468_s12 }
  0x1a   : > { %p1459_p12 = pneg %p1740_p11  ;;  %p1478_p10 = por %p1477_p7, %p1476_p5 }
  0x1c   : > { %p1471_p0 = pnand %p1469_p13, %p1459_p12 }
  0x1e   : > { %p1472_p3 = pneg %p1471_p0 }
  0x20   : > { %p1479_p9 = pnand %p1478_p10, %p1472_p3 }
  0x22   : > { %1482 = shalt.err (!%p1479_p9)
}
  0x23   : > { %s1645_s13 = smov 128   ;;  %s1646_s14 = smov 8  }
  0x24   : > { %s2146_s2 = sld [smem:[#allocation17_spill]]  ;;  %s1494_s17 = scalar_lea.vmem %s220_s11, 512 }
  0x25   : > { %p1495_p1 = scmp.ne.s32.totalorder %s220_s11, %s1494_s17  ;;  %p1502_p2 = scmp.lt.s32.totalorder %s220_s11, %s220_s11 }
  0x26   : > { %p1503_p6 = scmp.lt.s32.totalorder %s1494_s17, %s1494_s17 }
  0x27   : > { %p1497_p13 = pnand %p1495_p1, %p1459_p12 }
  0x28   : > { %p1504_p5 = por %p1503_p6, %p1502_p2 }
  0x29   : > { %p1498_p0 = pneg %p1497_p13 }
  0x2a   : > { %1397 = dma.hbm_to_vmem [thread:$0]  (!%p1740_p11), %s2146_s2, 512, %s207_s8, [#allocation7], %s1645_s13, %s1645_s13, %s1646_s14  }
  0x2b   : > { %p1505_p10 = pnand %p1504_p5, %p1498_p0 }
  0x2d   : > { %1508 = shalt.err (!%p1505_p10)
}
  0x2e   : > { %s2147_s3 = sld [smem:[#allocation18_spill]]  ;;  %s1763_s20 = sadd.s32 1, %s1641_s26  }
  0x2f   : > { %s34_s21 = sadd.s32 1, %s1637_s25  ;;  %s31_s22 = ssub.s32 %s1641_s26, %s1763_s20 }
  0x30   : > { %p41_p1 = scmp.ne.s32.totalorder %s1637_s25, %s1633_s24  ;;  %p32_p2 = scmp.eq.s32.totalorder %s31_s22, 0 }
  0x31   : > { %p42_p6 = scmp.eq.s32.totalorder %s1641_s26, 0  ;;  %p2148_p12 = scmp.eq.s32.totalorder %s1712_s5, 1 }
  0x32   : > { %p1414_p7 = scmp.lt.s32.totalorder %s1641_s26, 2  ;;  %s239_s8 = sand.u32 1, %s1637_s25  }
  0x33   : > { %p1773_p3 = por %p2148_p12, %p41_p1  ;;  %p43_p9 = por %p42_p6, %p41_p1 }
  0x34   : > { %1400 = dma.hbm_to_vmem [thread:$0]  (!%p1740_p11), %s2147_s3, 512, %s220_s11, [#allocation10], %s1645_s13, %s1645_s13, %s1646_s14  }
  0x35   : > { %s2149_s27 = scalar_select %p1773_p3, 1, 0 }
  0x36   : > { %s1779_s7 = scalar_select %p32_p2, %s1637_s25, %s34_s21  }
  0x37   : > { %s1782_s9 = sshll.u32 %s239_s8, 2  ;;  %s1377_s10 = sshll.u32 %s1641_s26, 6 }
  0x38   : > { %s1788_s13 = scalar_lea.hbm %s2129_s0, %s1377_s10  ;;  %s243_s14 = scalar_lea.vmem [#allocation3], %s1782_s9 }
  0x39   : > { %s251_s15 = sshll.u32 %s243_s14, 4  ;;  %p1793_p11 = pnand %p1414_p7, %p43_p9  ;;  %s1791_s15 = int_to_ptr.vmem [resolvable:$true] %s251_s15 }
  0x3a   : > { %s1800_s19 = scalar_lea.hbm %s2130_s1, %s1377_s10  ;;  %s258_s21 = sand.u32 1, %s1641_s26  }
  0x3b   : > { %s240_s22 = scalar_lea.sflag [#allocation4], %s239_s8  ;;  %s1509_s11 = scalar_lea.hbm %s1788_s13, 64 }
  0x3c   : > { %p1510_p13 = scmp.ne.s32.totalorder %s1788_s13, %s1509_s11  ;;  %p1511_p0 = pneg %p1793_p11 }
  0x3d   : > { %s1514_s2 = scalar_lea.hbm %s2129_s0, 128  ;;  %p1515_p1 = scmp.lt.s32.totalorder %s1788_s13, %s2129_s0 }
  0x3e   : > { %p1512_p5 = pnand %p1511_p0, %p1510_p13  ;;  %p1516_p2 = scmp.lt.s32.totalorder %s1514_s2, %s1509_s11 }
  0x40   : > { %p1513_p10 = pneg %p1512_p5  ;;  %p1517_p6 = por %p1516_p2, %p1515_p1 }
  0x42   : > { %p1518_p12 = pnand %p1517_p6, %p1513_p10 }
  0x44   : > { %1521 = shalt.err (!%p1518_p12)
}
  0x45   : > { %s1522_s8 = scalar_lea.vmem %s1791_s15, 64  ;;  %s1647_s10 = smov [#allocation3]  }
  0x46   : > { %p1523_p7 = scmp.ne.s32.totalorder %s1791_s15, %s1522_s8  ;;  %s1527_s18 = sshll.u32 %s1647_s10, 4  ;;  %s1528_s18 = int_to_ptr.vmem [resolvable:$false] %s1527_s18 }
  0x47   : > { %s1529_s12 = scalar_lea.vmem %s1528_s18, 128  ;;  %p1530_p5 = scmp.lt.s32.totalorder %s1791_s15, %s1528_s18 }
  0x48   : > { %p1525_p9 = pnand %p1523_p7, %p1511_p0  ;;  %p1531_p3 = scmp.lt.s32.totalorder %s1529_s12, %s1522_s8 }
  0x4a   : > { %p1526_p13 = pneg %p1525_p9  ;;  %p1532_p4 = por %p1531_p3, %p1530_p5 }
  0x4c   : > { %p1533_p1 = pnand %p1532_p4, %p1526_p13 }
  0x4e   : > { %1536 = shalt.err (!%p1533_p1)
}
  0x4f   : > { %1404 = dma.hbm_to_vmem [thread:$0]  (!%p1793_p11), %s1788_s13, 64, %s1791_s15, %s240_s22  }
  0x50   : > { %s262_s2 = scalar_lea.vmem [#allocation6], %s1782_s9  ;;  %s259_s11 = scalar_lea.sflag [#allocation7], %s258_s21 }
  0x51   : > { %s270_s3 = sshll.u32 %s262_s2, 4  ;;  %s1537_s14 = scalar_lea.hbm %s1800_s19, 64  ;;  %s271_s3 = int_to_ptr.vmem [resolvable:$true] %s270_s3 }
  0x52   : > { %p1538_p3 = scmp.ne.s32.totalorder %s1800_s19, %s1537_s14  ;;  %s1542_s10 = scalar_lea.hbm %s2130_s1, 128 }
  0x53   : > { %p1543_p2 = scmp.lt.s32.totalorder %s1800_s19, %s2130_s1  ;;  %p1544_p6 = scmp.lt.s32.totalorder %s1542_s10, %s1537_s14 }
  0x54   : > { %p1540_p4 = pnand %p1538_p3, %p1511_p0 }
  0x55   : > { %p1545_p12 = por %p1544_p6, %p1543_p2 }
  0x56   : > { %p1541_p10 = pneg %p1540_p4 }
  0x58   : > { %p1546_p7 = pnand %p1545_p12, %p1541_p10 }
  0x5a   : > { %1549 = shalt.err (!%p1546_p7)
}
  0x5b   : > { %s1550_s9 = scalar_lea.vmem %s271_s3, 64  ;;  %s1648_s13 = smov [#allocation6]  }
  0x5c   : > { %p1551_p9 = scmp.ne.s32.totalorder %s271_s3, %s1550_s9  ;;  %s1555_s15 = sshll.u32 %s1648_s13, 4  ;;  %s1556_s15 = int_to_ptr.vmem [resolvable:$false] %s1555_s15 }
  0x5d   : > { %s1557_s21 = scalar_lea.vmem %s1556_s15, 128  ;;  %p1558_p1 = scmp.lt.s32.totalorder %s271_s3, %s1556_s15 }
  0x5e   : > { %p1553_p13 = pnand %p1551_p9, %p1511_p0  ;;  %p1559_p3 = scmp.lt.s32.totalorder %s1557_s21, %s1550_s9 }
  0x60   : > { %p1554_p5 = pneg %p1553_p13  ;;  %p1560_p4 = por %p1559_p3, %p1558_p1 }
  0x62   : > { %p1561_p8 = pnand %p1560_p4, %p1554_p5 }
  0x64   : > { %1564 = shalt.err (!%p1561_p8)
}
  0x65   : > { %1407 = dma.hbm_to_vmem [thread:$0]  (!%p1793_p11), %s1800_s19, 64, %s271_s3, %s259_s11  }
  0x66   : > { %p2151_p10 = scmp.ne.s32.totalorder %s2144_s30, 0 }
  0x67   : > { %s1851_s22 = sand.u32 (!%p2151_p10), 1, %s1633_s24   ;;  %p2152_p0 = scmp.ne.s32.totalorder (!%p2151_p10), %s2142_s28, 0 }
  0x68   : > { %279 = sbr.rel (%p2151_p10) target bundleno = 597 (0x255), region = 44  ;;  %s1854_s2 = sshll.u32 (!%p2151_p10), %s1851_s22, 2 }
  0x69   : > { %s282_s14 = scalar_lea.sflag (!%p2151_p10), [#allocation4], %s1851_s22  ;;  %s285_s17 = scalar_lea.vmem (!%p2151_p10), [#allocation3], %s1854_s2 }
  0x6d   : > { %1608 = dma.done.wait (%p2152_p0), %s282_s14, 64  }
  0x6e   : > { %1610 = vsyncadd (%p2152_p0), %s282_s14, 4294967232  ;;  %s290_s30 = sand.u32 1, %s1712_s5   ;;  %s294_s19 = scalar_lea.vmem [#allocation6], %s1854_s2 }
  0x6f   : > { %s291_s16 = scalar_lea.sflag [#allocation7], %s290_s30 }
  0x70   : > { %1612 = dma.done.wait (%p2152_p0), %s291_s16, 64  }
  0x71   : > { %1614 = vsyncadd (%p2152_p0), %s291_s16, 4294967232  ;;  %p2153_p8 = scmp.eq.s32.totalorder %s1712_s5, 0 }
  0x73   : > { %1616 = dma.done.wait (%p2153_p8), [#allocation7], 512   ;;  %p2154_p11 = pmov %p2153_p8 }
  0x74   : > { %p2155_p2 = pmov %p2153_p8 }
  0x75   : > { %1618 = vsyncadd (%p2154_p11), [#allocation7], 4294966784 }
  0x76   : > { %1620 = dma.done.wait (%p2155_p2), [#allocation10], 512   ;;  %p2156_p6 = pmov %p2155_p2 }
  0x77   : > { %v341_v0 = vlaneseq  ;;  %v1649_v1 = vmov 0.0   ;;  %v340_v8 = vld [vmem:[%s294_s19] sm:$0xf]  ;;  %v1650_v16 = vmov 1.0   ;;  %v339_v20 = vld [vmem:[%s285_s17] sm:$0xf] }
  0x78   : > { %1622 = vsyncadd (%p2156_p6), [#allocation10], 4294966784  ;;  %611 = vmatprep.mubr.f32.mxu0 %v1649_v1  ;;  %700 = vmatprep.mubr.f32.mxu1 %v1649_v1  ;;  %v530_v25 = vld [vmem:[#allocation9] sm:$0xff]  ;;  %v531_v26 = vld [vmem:[#allocation9 + $0x8] sm:$0xff]  ;;  %s933_s11 = sld [smem:[#allocation2]]  ;;  %s1379_s8 = sshll.u32 %s1712_s5, 6 }
  0x79   : > { %v1879_v2 = vshrl.u32 %v341_v0, 7  ;;  %v532_v27 = vld [vmem:[#allocation9 + $0x10] sm:$0xff]  ;;  %v533_v28 = vld [vmem:[#allocation9 + $0x18] sm:$0xff]  ;;  %v526_v29 = vld [vmem:[#allocation8] sm:$0xff]  ;;  %s335_s10 = scalar_lea.vmem [#allocation11], %s1854_s2  ;;  %s1127_s13 = scalar_lea.hbm %s2135_s6, %s1379_s8 }
  0x7a   : > { %v527_v30 = vld [vmem:[#allocation8 + $0x8] sm:$0xff]  ;;  %v528_v31 = vld [vmem:[#allocation8 + $0x10] sm:$0xff]  ;;  %v529_v32 = vld [vmem:[#allocation8 + $0x18] sm:$0xff]  ;;  %s1129_s18 = sshll.u32 %s335_s10, 4  ;;  %s1115_s15 = scalar_lea.sflag [#allocation5], %s1851_s22  ;;  %s1130_s18 = int_to_ptr.vmem [resolvable:$true] %s1129_s18 }
  0x7b   : > { %v352_v3 = vsub.s32 1, %v1879_v2  ;;  %v360_v4 = vsub.s32 3, %v1879_v2  ;;  %v348_v5 = vsub.s32 0, %v1879_v2  ;;  %v356_v6 = vsub.s32 2, %v1879_v2  ;;  %s1565_s21 = scalar_lea.vmem %s1130_s18, 64  ;;  %p2157_p7 = scmp.ne.s32.totalorder %s2149_s27, 0 }
  0x7c   : > { %v413_v7 = vadd.s32 56, %v1879_v2  ;;  %v412_v9 = vadd.s32 48, %v1879_v2  ;;  %v411_v10 = vadd.s32 40, %v1879_v2  ;;  %v410_v15 = vadd.s32 32, %v1879_v2  ;;  %p1566_p12 = scmp.ne.s32.totalorder %s1130_s18, %s1565_s21  ;;  %s1652_s14 = smov [#allocation11]  }
  0x7d   : > { %v1890_v11 = vrot.slane %v340_v8, %v352_v3  ;;  %v1894_v12 = vrot.slane %v340_v8, %v360_v4  ;;  %v1898_v13 = vrot.slane %v340_v8, %v348_v5  ;;  %v1902_v14 = vrot.slane %v340_v8, %v356_v6  ;;  %s1569_s5 = sshll.u32 %s1652_s14, 4  ;;  %s1570_s5 = int_to_ptr.vmem [resolvable:$false] %s1569_s5 }
  0x7e   : > { %v1920_v17 = vadd.s32 24, %v1879_v2  ;;  %v1931_v18 = vadd.s32 16, %v1879_v2  ;;  %v1944_v19 = vadd.s32 8, %v1879_v2  ;;  %v1974_v21 = vrot.slane %v339_v20, %v352_v3  ;;  %p1567_p9 = pnand %p1566_p12, %p2157_p7  ;;  %s1571_s2 = scalar_lea.vmem %s1570_s5, 128 }
  0x7f   : > { %vm459_vm0 = vcmp.eq.s32.totalorder %v413_v7, %v1890_v11  ;;  %vm461_vm1 = vcmp.eq.s32.totalorder %v413_v7, %v1894_v12  ;;  %vm458_vm2 = vcmp.eq.s32.totalorder %v413_v7, %v1898_v13  ;;  %vm460_vm3 = vcmp.eq.s32.totalorder %v413_v7, %v1902_v14  ;;  %p1572_p5 = scmp.lt.s32.totalorder %s1130_s18, %s1570_s5  ;;  %p1573_p1 = scmp.lt.s32.totalorder %s1571_s2, %s1565_s21 }
  0x80   : > { %1306 = vmatprep.subr.msk.mxu0 %vm459_vm0, %v1650_v16  ;;  %1326 = vmatprep.subr.msk.mxu1 %vm461_vm1, %v1650_v16  ;;  %vm455_vm4 = vcmp.eq.s32.totalorder %v412_v9, %v1890_v11  ;;  %vm457_vm5 = vcmp.eq.s32.totalorder %v412_v9, %v1894_v12  ;;  %vm454_vm6 = vcmp.eq.s32.totalorder %v412_v9, %v1898_v13  ;;  %p1568_p13 = pneg %p1567_p9 }
  0x81   : > { %1307 = vmatpush1.msk.msra.mxu0 %vm458_vm2, %v1650_v16  ;;  %1327 = vmatpush1.msk.msra.mxu1 %vm460_vm3, %v1650_v16  ;;  %vm456_vm7 = vcmp.eq.s32.totalorder %v412_v9, %v1902_v14  ;;  %vm451_vm8 = vcmp.eq.s32.totalorder %v411_v10, %v1890_v11  ;;  %vm453_vm9 = vcmp.eq.s32.totalorder %v411_v10, %v1894_v12  ;;  %p1574_p3 = por %p1573_p1, %p1572_p5 }
  0x82   : > { %1308 = vmatprep.subr.msk.mxu0 %vm455_vm4, %v1650_v16  ;;  %1328 = vmatprep.subr.msk.mxu1 %vm457_vm5, %v1650_v16  ;;  %vm450_vm10 = vcmp.eq.s32.totalorder %v411_v10, %v1898_v13  ;;  %vm452_vm11 = vcmp.eq.s32.totalorder %v411_v10, %v1902_v14  ;;  %vm447_vm12 = vcmp.eq.s32.totalorder %v410_v15, %v1890_v11 }
  0x83   : > { %1309 = vmatpush1.msk.msra.mxu0 %vm454_vm6, %v1650_v16  ;;  %1329 = vmatpush1.msk.msra.mxu1 %vm456_vm7, %v1650_v16  ;;  %vm449_vm13 = vcmp.eq.s32.totalorder %v410_v15, %v1894_v12  ;;  %vm446_vm14 = vcmp.eq.s32.totalorder %v410_v15, %v1898_v13  ;;  %vm448_vm15 = vcmp.eq.s32.totalorder %v410_v15, %v1902_v14  ;;  %p1575_p4 = pnand %p1574_p3, %p1568_p13 }
  0x84   : > { %1310 = vmatprep.subr.msk.mxu0 %vm451_vm8, %v1650_v16  ;;  %1330 = vmatprep.subr.msk.mxu1 %vm453_vm9, %v1650_v16  ;;  %vm443_vm0 = vcmp.eq.s32.totalorder %v1920_v17, %v1890_v11  ;;  %vm445_vm1 = vcmp.eq.s32.totalorder %v1920_v17, %v1894_v12  ;;  %vm442_vm2 = vcmp.eq.s32.totalorder %v1920_v17, %v1898_v13 }
  0x85   : > { %1311 = vmatpush1.msk.msra.mxu0 %vm450_vm10, %v1650_v16  ;;  %1331 = vmatpush1.msk.msra.mxu1 %vm452_vm11, %v1650_v16  ;;  %vm444_vm3 = vcmp.eq.s32.totalorder %v1920_v17, %v1902_v14  ;;  %vm439_vm4 = vcmp.eq.s32.totalorder %v1931_v18, %v1890_v11  ;;  %vm441_vm5 = vcmp.eq.s32.totalorder %v1931_v18, %v1894_v12 }
  0x86   : > { %1312 = vmatprep.subr.msk.mxu0 %vm447_vm12, %v1650_v16  ;;  %1332 = vmatprep.subr.msk.mxu1 %vm449_vm13, %v1650_v16  ;;  %vm438_vm6 = vcmp.eq.s32.totalorder %v1931_v18, %v1898_v13  ;;  %vm440_vm7 = vcmp.eq.s32.totalorder %v1931_v18, %v1902_v14  ;;  %vm435_vm8 = vcmp.eq.s32.totalorder %v1944_v19, %v1890_v11 }
  0x87   : > { %1313 = vmatpush1.msk.msra.mxu0 %vm446_vm14, %v1650_v16  ;;  %1333 = vmatpush1.msk.msra.mxu1 %vm448_vm15, %v1650_v16  ;;  %vm437_vm9 = vcmp.eq.s32.totalorder %v1944_v19, %v1894_v12  ;;  %vm434_vm10 = vcmp.eq.s32.totalorder %v1944_v19, %v1898_v13  ;;  %vm436_vm11 = vcmp.eq.s32.totalorder %v1944_v19, %v1902_v14 }
  0x88   : > { %1314 = vmatprep.subr.msk.mxu0 %vm443_vm0, %v1650_v16  ;;  %1334 = vmatprep.subr.msk.mxu1 %vm445_vm1, %v1650_v16  ;;  %v1984_v22 = vrot.slane %v339_v20, %v360_v4  ;;  %vm431_vm12 = vcmp.eq.s32.totalorder %v1879_v2, %v1890_v11  ;;  %vm433_vm13 = vcmp.eq.s32.totalorder %v1879_v2, %v1894_v12  ;;  %vm534_vm0 = vcmask 523264  }
  0x89   : > { %1315 = vmatpush1.msk.msra.mxu0 %vm442_vm2, %v1650_v16  ;;  %1335 = vmatpush1.msk.msra.mxu1 %vm444_vm3, %v1650_v16  ;;  %v1994_v23 = vrot.slane %v339_v20, %v348_v5  ;;  %vm430_vm14 = vcmp.eq.s32.totalorder %v1879_v2, %v1898_v13  ;;  %vm432_vm15 = vcmp.eq.s32.totalorder %v1879_v2, %v1902_v14 }
  0x8a   : > { %1316 = vmatprep.subr.msk.mxu0 %vm439_vm4, %v1650_v16  ;;  %1336 = vmatprep.subr.msk.mxu1 %vm441_vm5, %v1650_v16  ;;  %v357_v24 = vrot.slane %v339_v20, %v356_v6  ;;  %vm375_vm1 = vcmp.eq.s32.totalorder %v1920_v17, %v1974_v21  ;;  %vm377_vm2 = vcmp.eq.s32.totalorder %v1920_v17, %v1984_v22 }
  0x8b   : > { %1317 = vmatpush1.msk.msra.mxu0 %vm438_vm6, %v1650_v16  ;;  %1337 = vmatpush1.msk.msra.mxu1 %vm440_vm7, %v1650_v16  ;;  %vm374_vm3 = vcmp.eq.s32.totalorder %v1920_v17, %v1994_v23  ;;  %vm371_vm5 = vcmp.eq.s32.totalorder %v1931_v18, %v1974_v21  ;;  %vm373_vm6 = vcmp.eq.s32.totalorder %v1931_v18, %v1984_v22 }
  0x8c   : > { %1318 = vmatprep.subr.msk.mxu0 %vm435_vm8, %v1650_v16  ;;  %1338 = vmatprep.subr.msk.mxu1 %vm437_vm9, %v1650_v16  ;;  %vm376_vm4 = vcmp.eq.s32.totalorder %v1920_v17, %v357_v24  ;;  %vm370_vm7 = vcmp.eq.s32.totalorder %v1931_v18, %v1994_v23  ;;  %vm372_vm8 = vcmp.eq.s32.totalorder %v1931_v18, %v357_v24 }
  0x8d   : > { %1319 = vmatpush1.msk.msra.mxu0 %vm434_vm10, %v1650_v16  ;;  %1339 = vmatpush1.msk.msra.mxu1 %vm436_vm11, %v1650_v16  ;;  %vm367_vm9 = vcmp.eq.s32.totalorder %v1944_v19, %v1974_v21  ;;  %vm369_vm10 = vcmp.eq.s32.totalorder %v1944_v19, %v1984_v22  ;;  %vm366_vm11 = vcmp.eq.s32.totalorder %v1944_v19, %v1994_v23 }
  0x8e   : > { %1320 = vmatprep.subr.msk.mxu0 %vm431_vm12, %v1650_v16  ;;  %1340 = vmatprep.subr.msk.mxu1 %vm433_vm13, %v1650_v16  ;;  %vm368_vm12 = vcmp.eq.s32.totalorder %v1944_v19, %v357_v24  ;;  %vm363_vm13 = vcmp.eq.s32.totalorder %v1879_v2, %v1974_v21 }
  0x8f   : > { %1321 = vmatpush1.msk.msra.mxu0 %vm430_vm14, %v1650_v16  ;;  %1341 = vmatpush1.msk.msra.mxu1 %vm432_vm15, %v1650_v16  ;;  %vm365_vm14 = vcmp.eq.s32.totalorder %v1879_v2, %v1984_v22  ;;  %vm362_vm15 = vcmp.eq.s32.totalorder %v1879_v2, %v1994_v23 }
  0x90   : > { %1322 = vmatmul.mubr.msk.f32.vlgmr.msra.gmra.mxu0 %vm534_vm0, %v530_v25  ;;  %1342 = vmatmul.mubr.msk.f32.vlgmr.msra.gmra.mxu1 %vm534_vm0, %v530_v25 }
  0x91   : > { %617 = vmatprep.mubr.f32.mxu0 %v1649_v1  ;;  %706 = vmatprep.mubr.f32.mxu1 %v1649_v1 }
  0x92   : > { %1346 = vmatprep.subr.msk.mxu0 %vm375_vm1, %v1650_v16  ;;  %1358 = vmatprep.subr.msk.mxu1 %vm377_vm2, %v1650_v16  ;;  %vm364_vm1 = vcmp.eq.s32.totalorder %v1879_v2, %v357_v24  ;;  %vm725_vm2 = vcmask 261120  }
  0x93   : > { %1347 = vmatpush1.msk.msra.mxu0 %vm374_vm3, %v1650_v16  ;;  %1359 = vmatpush1.msk.msra.mxu1 %vm376_vm4, %v1650_v16 }
  0x94   : > { %1323 = vmatmul.mubr.msk.f32.gmra.mxu0 %vm534_vm0, %v531_v26  ;;  %1343 = vmatmul.mubr.msk.f32.gmra.mxu1 %vm534_vm0, %v531_v26 }
  0x95   : > { %623 = vmatprep.mubr.f32.mxu0 %v1649_v1  ;;  %712 = vmatprep.mubr.f32.mxu1 %v1649_v1 }
  0x96   : > { %1348 = vmatprep.subr.msk.mxu0 %vm371_vm5, %v1650_v16  ;;  %1360 = vmatprep.subr.msk.mxu1 %vm373_vm6, %v1650_v16 }
  0x97   : > { %1349 = vmatpush1.msk.msra.mxu0 %vm370_vm7, %v1650_v16  ;;  %1361 = vmatpush1.msk.msra.mxu1 %vm372_vm8, %v1650_v16 }
  0x98   : > { %1324 = vmatmul.mubr.msk.f32.gmra.mxu0 %vm534_vm0, %v532_v27  ;;  %1344 = vmatmul.mubr.msk.f32.gmra.mxu1 %vm534_vm0, %v532_v27 }
  0x99   : > { %629 = vmatprep.mubr.f32.mxu0 %v1649_v1  ;;  %718 = vmatprep.mubr.f32.mxu1 %v1649_v1 }
  0x9a   : > { %1350 = vmatprep.subr.msk.mxu0 %vm367_vm9, %v1650_v16  ;;  %1362 = vmatprep.subr.msk.mxu1 %vm369_vm10, %v1650_v16 }
  0x9b   : > { %1351 = vmatpush1.msk.msra.mxu0 %vm366_vm11, %v1650_v16  ;;  %1363 = vmatpush1.msk.msra.mxu1 %vm368_vm12, %v1650_v16 }
  0x9c   : > { %1325 = vmatmul.mubr.msk.f32.gmra.mxu0 %vm534_vm0, %v533_v28  ;;  %1345 = vmatmul.mubr.msk.f32.gmra.mxu1 %vm534_vm0, %v533_v28  ;;  %vm1111_vm0 = vcmp.lt.s32.totalorder %v341_v0, 512 }
  0x9d   : > { %1352 = vmatprep.subr.msk.mxu0 %vm363_vm13, %v1650_v16  ;;  %1364 = vmatprep.subr.msk.mxu1 %vm365_vm14, %v1650_v16 }
  0x9e   : > { %1353 = vmatpush1.msk.msra.mxu0 %vm362_vm15, %v1650_v16  ;;  %802 = vmatprep.mubr.f32.mxu0 %v1649_v1 }
  0x9f   : > { %1365 = vmatpush1.msk.msra.mxu1 %vm364_vm1, %v1650_v16  ;;  %891 = vmatprep.mubr.f32.mxu1 %v1649_v1 }
  0xa0   : > { %1354 = vmatmul.mubr.msk.f32.vlgmr.msra.gmra.mxu0 %vm725_vm2, %v526_v29  ;;  %1366 = vmatmul.mubr.msk.f32.vlgmr.msra.gmra.mxu1 %vm725_vm2, %v526_v29 }
  0xa1   : > { %808 = vmatprep.mubr.f32.mxu0 %v1649_v1  ;;  %897 = vmatprep.mubr.f32.mxu1 %v1649_v1 }
  0xa4   : > { %1355 = vmatmul.mubr.msk.f32.gmra.mxu0 %vm725_vm2, %v527_v30  ;;  %1367 = vmatmul.mubr.msk.f32.gmra.mxu1 %vm725_vm2, %v527_v30 }
  0xa5   : > { %814 = vmatprep.mubr.f32.mxu0 %v1649_v1  ;;  %903 = vmatprep.mubr.f32.mxu1 %v1649_v1 }
  0xa8   : > { %1356 = vmatmul.mubr.msk.f32.gmra.mxu0 %vm725_vm2, %v528_v31  ;;  %1368 = vmatmul.mubr.msk.f32.gmra.mxu1 %vm725_vm2, %v528_v31 }
  0xa9   : > { %820 = vmatprep.mubr.f32.mxu0 %v1649_v1  ;;  %909 = vmatprep.mubr.f32.mxu1 %v1649_v1 }
  0xac   : > { %1357 = vmatmul.mubr.msk.f32.gmra.mxu0 %vm725_vm2, %v529_v32  ;;  %1369 = vmatmul.mubr.msk.f32.gmra.mxu1 %vm725_vm2, %v529_v32 }
  0xad   : > { %1002 = vmatprep.mubr.f32.mxu0 %v1649_v1  ;;  %1073 = vmatprep.mubr.f32.mxu1 %v1649_v1 }
 0x150   : > { %v613_v33 = vpop.f32.mrf.mxu0  ;;  %v702_v34 = vpop.f32.mrf.mxu1 }
 0x152   : > { %v615_v35 = vpop.f32.mrf.mxu0  ;;  %v704_v36 = vpop.f32.mrf.mxu1 }
 0x154   : > { %v619_v37 = vpop.f32.mrf.mxu0  ;;  %v708_v38 = vpop.f32.mrf.mxu1 }
 0x156   : > { %v621_v39 = vpop.f32.mrf.mxu0  ;;  %v710_v40 = vpop.f32.mrf.mxu1 }
 0x158   : > { %v625_v41 = vpop.f32.mrf.mxu0  ;;  %v714_v42 = vpop.f32.mrf.mxu1 }
 0x15a   : > { %v627_v43 = vpop.f32.mrf.mxu0  ;;  %v716_v44 = vpop.f32.mrf.mxu1 }
 0x15c   : > { %v631_v45 = vpop.f32.mrf.mxu0  ;;  %v720_v46 = vpop.f32.mrf.mxu1 }
 0x15e   : > { %v633_v47 = vpop.f32.mrf.mxu0  ;;  %v722_v48 = vpop.f32.mrf.mxu1 }
 0x160   : > { %v804_v49 = vpop.f32.mrf.mxu0  ;;  %v893_v50 = vpop.f32.mrf.mxu1 }
 0x161   : > { %v805_v23 = vadd.f32 %v804_v49, %v613_v33  ;;  %v894_v24 = vadd.f32 %v893_v50, %v702_v34  ;;  %v932_v33 = vld [vmem:[%s2133_s4] sm:$0x1]  ;;  %v1651_v34 = vmov 1966171168  }
 0x162   : > { %v806_v51 = vpop.f32.mrf.mxu0  ;;  %v895_v52 = vpop.f32.mrf.mxu1 }
 0x163   : > { %v807_v19 = vadd.f32 %v806_v51, %v615_v35  ;;  %v896_v20 = vadd.f32 %v895_v52, %v704_v36  ;;  %v916_v35 = vmax.f32 %v805_v23, 0.0  ;;  %v918_v36 = vmax.f32 %v894_v24, 0.0 }
 0x164   : > { %v810_v53 = vpop.f32.mrf.mxu0  ;;  %v899_v54 = vpop.f32.mrf.mxu1 }
 0x165   : > { %v811_v15 = vadd.f32 %v810_v53, %v619_v37  ;;  %v900_v16 = vadd.f32 %v899_v54, %v708_v38  ;;  %v917_v31 = vmax.f32 %v807_v19, 0.0  ;;  %v919_v32 = vmax.f32 %v896_v20, 0.0 }
 0x166   : > { %v812_v55 = vpop.f32.mrf.mxu0  ;;  %v901_v56 = vpop.f32.mrf.mxu1  ;;  %v1087_v37 = vunpack.c.l.s4 %v1651_v34 }
 0x167   : > { %v813_v11 = vadd.f32 %v812_v55, %v621_v39  ;;  %v902_v12 = vadd.f32 %v901_v56, %v710_v40  ;;  %v920_v29 = vmax.f32 %v811_v15, 0.0  ;;  %v922_v30 = vmax.f32 %v900_v16, 0.0 }
 0x168   : > { %v816_v57 = vpop.f32.mrf.mxu0  ;;  %v905_v58 = vpop.f32.mrf.mxu1  ;;  %v1088_v38 = vunpack.c.0.s8 %v1087_v37  ;;  %v934_v39 = vstv %s933_s11 }
 0x169   : > { %v817_v9 = vadd.f32 %v816_v57, %v625_v41  ;;  %v906_v10 = vadd.f32 %v905_v58, %v714_v42  ;;  %v921_v27 = vmax.f32 %v813_v11, 0.0  ;;  %v923_v28 = vmax.f32 %v902_v12, 0.0 }
 0x16a   : > { %v818_v59 = vpop.f32.mrf.mxu0  ;;  %v907_v60 = vpop.f32.mrf.mxu1 }
 0x16b   : > { %v819_v5 = vadd.f32 %v818_v59, %v627_v43  ;;  %v908_v6 = vadd.f32 %v907_v60, %v716_v44  ;;  %v924_v25 = vmax.f32 %v817_v9, 0.0  ;;  %v926_v26 = vmax.f32 %v906_v10, 0.0 }
 0x16c   : > { %v822_v61 = vpop.f32.mrf.mxu0  ;;  %v911_v62 = vpop.f32.mrf.mxu1  ;;  %v1091_v43 = vsub.s32 %v1088_v38, %v1879_v2 }
 0x16d   : > { %v823_v63 = vadd.f32 %v822_v61, %v631_v45  ;;  %v912_v1 = vadd.f32 %v911_v62, %v720_v46  ;;  %v925_v21 = vmax.f32 %v819_v5, 0.0  ;;  %v927_v22 = vmax.f32 %v908_v6, 0.0 }
 0x16e   : > { %v824_v3 = vpop.f32.mrf.mxu0  ;;  %v913_v4 = vpop.f32.mrf.mxu1 }
 0x16f   : > { %v825_v7 = vadd.f32 %v824_v3, %v633_v47  ;;  %v914_v8 = vadd.f32 %v913_v4, %v722_v48  ;;  %v928_v17 = vmax.f32 %v823_v63, 0.0  ;;  %v930_v18 = vmax.f32 %v912_v1, 0.0 }
 0x171   : > { %v929_v13 = vmax.f32 %v825_v7, 0.0  ;;  %v931_v14 = vmax.f32 %v914_v8, 0.0 }
 0x173   : > { %962 = vmatprep.subr.mxu0 %v929_v13  ;;  %1033 = vmatprep.subr.mxu1 %v931_v14 }
 0x174   : > { %963 = vmatpush1.msra.mxu0 %v928_v17  ;;  %1034 = vmatpush1.msra.mxu1 %v930_v18 }
 0x175   : > { %964 = vmatprep.subr.mxu0 %v925_v21  ;;  %1035 = vmatprep.subr.mxu1 %v927_v22 }
 0x176   : > { %965 = vmatpush1.msra.mxu0 %v924_v25  ;;  %1036 = vmatpush1.msra.mxu1 %v926_v26 }
 0x177   : > { %966 = vmatprep.subr.mxu0 %v921_v27  ;;  %1037 = vmatprep.subr.mxu1 %v923_v28 }
 0x178   : > { %967 = vmatpush1.msra.mxu0 %v920_v29  ;;  %1038 = vmatpush1.msra.mxu1 %v922_v30 }
 0x179   : > { %968 = vmatprep.subr.mxu0 %v917_v31  ;;  %1039 = vmatprep.subr.mxu1 %v919_v32 }
 0x17a   : > { %969 = vmatpush1.msra.mxu0 %v916_v35  ;;  %1040 = vmatpush1.msra.mxu1 %v918_v36 }
 0x17b   : > { %1370 = vmatmul.mubr.msk.f32.vlgmr.msra.gmra.mxu0 %vm725_vm2, %v932_v33  ;;  %1371 = vmatmul.mubr.msk.f32.vlgmr.msra.gmra.mxu1 %vm725_vm2, %v932_v33 }
 0x23b   : > { %v1004_v40 = vpop.f32.mrf.mxu0  ;;  %v1075_v41 = vpop.f32.mrf.mxu1 }
 0x23c   : > { %v1005_v45 = vadd.f32 %v1004_v40, %v934_v39  ;;  %v1076_v46 = vadd.f32 %v1075_v41, %v934_v39 }
 0x23d   : > { %v1006_v42 = vpop.f32.mrf.mxu0  ;;  %v1077_v44 = vpop.f32.mrf.mxu1 }
 0x23e   : > { %v1007_v47 = vadd.f32 %v1006_v42, %v934_v39  ;;  %v1078_v48 = vadd.f32 %v1077_v44, %v934_v39 }
 0x240   : > { %v1084_v49 = vcombine.low %v1005_v45, %v1007_v47  ;;  %v1085_v50 = vcombine.low %v1076_v46, %v1078_v48 }
 0x242   : > { %v1092_v51 = vrot.slane %v1084_v49, %v1091_v43  ;;  %v1099_v52 = vrot.slane %v1085_v50, %v1091_v43 }
 0x244   : > { %v1100_v53 = vcombine.low %v1092_v51, %v1099_v52 }
 0x246   : > { %v1107_v54 = vrot.slane %v1100_v53, %v1091_v43 }
 0x248   : > { %1113 = vst.msk [vmem:[%s335_s10] sm:$0xf] %vm1111_vm0, %v1107_v54 }
 0x249   : > { %1578 = shalt.err (!%p1575_p4)
}
 0x24a   : > { %s1579_s17 = scalar_lea.hbm %s1127_s13, 64  ;;  %s1583_s16 = scalar_lea.hbm %s2135_s6, 128 }
 0x24b   : > { %p1580_p10 = scmp.ne.s32.totalorder %s1127_s13, %s1579_s17  ;;  %p1584_p11 = scmp.lt.s32.totalorder %s1127_s13, %s2135_s6 }
 0x24c   : > { %p1585_p2 = scmp.lt.s32.totalorder %s1583_s16, %s1579_s17 }
 0x24d   : > { %p1581_p0 = pnand %p1580_p10, %p2157_p7 }
 0x24e   : > { %p1586_p6 = por %p1585_p2, %p1584_p11 }
 0x24f   : > { %p1582_p8 = pneg %p1581_p0 }
 0x251   : > { %p1587_p12 = pnand %p1586_p6, %p1582_p8 }
 0x253   : > { %1590 = shalt.err (!%p1587_p12)
}
 0x254   : > { %1392 = dma.vmem_to_hbm [thread:$0]  (%p2157_p7), %s1130_s18, 64, %s1127_s13, %s1115_s15  }
 0x255 PF: > { %s1141_s3 = sand.u32 1, %s1629_s23   ;;  %p2158_p9 = scmp.ne.s32.totalorder %s2143_s29, 0 }
 0x256   : > { %p2159_p13 = scmp.ge.s32.totalorder %s1641_s26, 2  ;;  %s1142_s11 = scalar_lea.sflag [#allocation5], %s1141_s3 }
 0x258   : > { %p1409_p5 = pnand %p2159_p13, %p2158_p9 }
 0x25a   : > { %p1410_p1 = pneg %p1409_p5 }
 0x25c   : > { %1624 = dma.done.wait (%p1410_p1), %s1142_s11, 64  }
 0x25d   : > { %1626 = vsyncadd (%p1410_p1), %s1142_s11, 4294967232  ;;  %p24_p3 = scmp.ge.s32.totalorder %s1763_s20, 4   ;;  %s2160_s23 = smov %s1633_s24 }
 0x25e   : > { %s2161_s24 = smov %s1637_s25  ;;  %s2162_s25 = smov %s1779_s7 }
 0x25f   : > { %s2163_s26 = smov %s1763_s20  ;;  %26 = sbr.rel (!%p24_p3) target bundleno = 12 (0xc), region = 110 }
 0x264   :  { %1147 = vsyncpa [#allocation4], 1 }
 0x265   :  { %1149 = vsyncpa [#allocation4 + $0x1], 1 }
 0x266   :  { %1150 = vsyncpa [#allocation7], 1 }
 0x267   :  { %1152 = vsyncpa [#allocation7 + $0x1], 1 }
 0x268   :  { %1153 = vsyncpa [#allocation10], 1 }
 0x269   :  { %1154 = vsyncpa [#allocation5], 1 }
 0x26a   :  { %1156 = vsyncpa [#allocation5 + $0x1], 1 }

</bundles_post_ra>
